<compile_context>
chip_gen: v7x
topology: tpu7x:2x2x1
jax: 0.10.0
libtpu: 0.0.40
codegen_flags: <defaults>
</compile_context>

<pallas_src>
import functools
import math

import jax
import jax.numpy as jnp
from jax import lax
from jax.experimental import pallas as pl
from jax.experimental.pallas import tpu as pltpu


def _classifier_kernel(x_ref, gamma_ref, beta_ref, w1_ref, b1_ref,
                       w2t_ref, b2_ref, o_ref, z_ref, *,
                       eps: float, bb: int, s_out: int):
    # Per grid step:
    #   x_ref:      (BB, S_in, E)
    #   gamma/beta: (1, E)
    #   w1_ref:     (S_out, S_in)     b1_ref: (S_out, 1)
    #   w2t_ref:    (E, C)            b2_ref: (1, C)
    #   o_ref:      (BB, S_out, C)
    #   z_ref:      VMEM scratch (BB*S_out, E) f32

    # MXU operand dtype: keep native bf16 (f32 accumulation); otherwise f32.
    mm_dtype = jnp.bfloat16 if x_ref.dtype == jnp.bfloat16 else jnp.float32

    # --- LayerNorm over the embedding (last / lane) axis, f32 math ----------
    x = x_ref[...].astype(jnp.float32)                       # (BB, S_in, E)
    mean = jnp.mean(x, axis=-1, keepdims=True)
    xc = x - mean
    var = jnp.mean(xc * xc, axis=-1, keepdims=True)
    xn = xc * lax.rsqrt(var + eps)
    xn = xn * gamma_ref[...].astype(jnp.float32) + beta_ref[...].astype(jnp.float32)
    xn = xn.astype(mm_dtype)

    w1 = w1_ref[...].astype(mm_dtype)
    b1 = b1_ref[...].astype(jnp.float32)

    # --- SwapAxes(-2,-1) + Linear(S_in -> S_out), folded --------------------
    # z[b] = W1 @ LN(x[b]) + b1    (per-b 2-D MXU matmul; no transpose ever
    # materialized).  Results are stacked row-wise into a 2-D f32 scratch so
    # the second linear runs as a single large matmul.
    for b in range(bb):
        zb = jnp.dot(w1, xn[b], preferred_element_type=jnp.float32)  # (S_out, E)
        z_ref[b * s_out:(b + 1) * s_out, :] = zb + b1

    # --- SwapAxes(-2,-1) + Linear(E -> num_classes), folded -----------------
    # One (BB*S_out, E) @ (E, C) matmul: the "swap" is realized by contracting
    # E against W2^T's leading axis; output rows are (b, t) pairs, lane = C.
    z = z_ref[...].astype(mm_dtype)
    w2t = w2t_ref[...].astype(mm_dtype)
    out = jnp.dot(z, w2t, preferred_element_type=jnp.float32)        # (BB*S_out, C)
    out = out + b2_ref[...].astype(jnp.float32)

    for b in range(bb):
        o_ref[b] = out[b * s_out:(b + 1) * s_out, :].astype(o_ref.dtype)


def _pick_block_batch(B, S_in, E, itemsize, *, max_unroll=8,
                      x_block_budget=4 << 20):
    """Largest divisor of B (<= max_unroll) whose x-block fits the VMEM budget."""
    bb = 1
    for cand in range(1, min(B, max_unroll) + 1):
        if B % cand == 0 and cand * S_in * E * itemsize <= x_block_budget:
            bb = cand
    # Keep >= 2 grid steps (v7x has 2 TensorCores) when we can do it without
    # shrinking the per-step batch below a useful size.
    if B // bb == 1 and bb >= 8 and bb % 2 == 0:
        bb //= 2
    return bb


def classifier_forward(x, gamma, beta, w1, b1, w2, b2, *, eps: float = 1e-5):
    """Pallas TPU forward of the PyTorch Classifier.

    x: (B, S_in, E), gamma/beta: (E,), w1: (S_out, S_in), b1: (S_out,),
    w2: (C, E), b2: (C,).  Returns logits (B, S_out, C).
    """
    B, S_in, E = x.shape
    S_out, s_in_w = w1.shape
    C, e_w = w2.shape
    assert s_in_w == S_in and e_w == E

    bb = _pick_block_batch(B, S_in, E, x.dtype.itemsize)
    grid = (B // bb,)

    # 2-D parameter views; W2 pre-transposed ONCE (constant parameter) so the
    # kernel's second matmul contracts E in the MXU-natural orientation.
    gamma2 = gamma.reshape(1, E)
    beta2 = beta.reshape(1, E)
    b1_2 = b1.reshape(S_out, 1)
    b2_2 = b2.reshape(1, C)
    w2t = w2.T                                                # (E, C)

    kernel = functools.partial(_classifier_kernel, eps=eps, bb=bb, s_out=S_out)

    itemsize = x.dtype.itemsize
    cost = pl.CostEstimate(
        flops=2 * B * (S_out * S_in * E + S_out * E * C),
        transcendentals=B * S_in,
        bytes_accessed=(x.size * itemsize
                        + w1.size * w1.dtype.itemsize
                        + w2.size * w2.dtype.itemsize
                        + (gamma.size + beta.size + b1.size + b2.size) * itemsize
                        + B * S_out * C * itemsize))

    # TODO(synk): for very large S_in*E (v7x 64 MiB VMEM), add a trailing
    # "arbitrary" S_in-reduction grid axis accumulating W1 @ LN(x) into the
    # scratch instead of relying on the BB cap alone.
    return pl.pallas_call(
        kernel,
        out_shape=jax.ShapeDtypeStruct((B, S_out, C), x.dtype),
        grid=grid,
        in_specs=[
            pl.BlockSpec((bb, S_in, E), lambda g: (g, 0, 0)),     # x block
            pl.BlockSpec((1, E), lambda g: (0, 0)),               # gamma
            pl.BlockSpec((1, E), lambda g: (0, 0)),               # beta
            pl.BlockSpec((S_out, S_in), lambda g: (0, 0)),        # W1
            pl.BlockSpec((S_out, 1), lambda g: (0, 0)),           # b1
            pl.BlockSpec((E, C), lambda g: (0, 0)),               # W2^T
            pl.BlockSpec((1, C), lambda g: (0, 0)),               # b2
        ],
        out_specs=pl.BlockSpec((bb, S_out, C), lambda g: (g, 0, 0)),
        scratch_shapes=[pltpu.VMEM((bb * S_out, E), jnp.float32)],
        compiler_params=pltpu.CompilerParams(
            dimension_semantics=("parallel",)),                   # v7x dual-TC
        cost_estimate=cost,
    )(x, gamma2, beta2, w1, b1_2, w2t, b2_2)


class Classifier:
    """Mirror of the PyTorch nn.Module (parameters held as JAX arrays)."""

    def __init__(self, key, input_sequence_length, output_sequence_length,
                 embedding_dim, num_classes, dtype=jnp.float32):
        k1, k2, k3, k4, k5, k6 = jax.random.split(key, 6)
        self.eps = 1e-5
        # LayerNorm affine params (randomized so the affine path is exercised).
        self.gamma = 1.0 + 0.1 * jax.random.normal(k1, (embedding_dim,), dtype)
        self.beta = 0.1 * jax.random.normal(k2, (embedding_dim,), dtype)
        # Linear(S_in -> S_out), PyTorch layout W: (out_features, in_features).
        lim1 = 1.0 / math.sqrt(input_sequence_length)
        self.w1 = jax.random.uniform(
            k3, (output_sequence_length, input_sequence_length), dtype, -lim1, lim1)
        self.b1 = jax.random.uniform(k4, (output_sequence_length,), dtype, -lim1, lim1)
        # Linear(E -> num_classes)
        lim2 = 1.0 / math.sqrt(embedding_dim)
        self.w2 = jax.random.uniform(k5, (num_classes, embedding_dim), dtype, -lim2, lim2)
        self.b2 = jax.random.uniform(k6, (num_classes,), dtype, -lim2, lim2)

    def __call__(self, x):
        return classifier_forward(x, self.gamma, self.beta, self.w1, self.b1,
                                  self.w2, self.b2, eps=self.eps)


def _reference_forward(x, gamma, beta, w1, b1, w2, b2, eps=1e-5):
    """Pure-JAX reference following the PyTorch module literally (with swaps)."""
    mean = x.mean(-1, keepdims=True)
    var = ((x - mean) ** 2).mean(-1, keepdims=True)
    xn = (x - mean) * lax.rsqrt(var + eps) * gamma + beta     # (B, S_in, E)
    h = jnp.swapaxes(xn, -2, -1)                              # (B, E, S_in)
    h = h @ w1.T + b1                                         # (B, E, S_out)
    h = jnp.swapaxes(h, -2, -1)                               # (B, S_out, E)
    return h @ w2.T + b2                                      # (B, S_out, C)


if __name__ == "__main__":
    key = jax.random.PRNGKey(0)
    k_x, k_p = jax.random.split(key)

    # batch=2, input_seq=8, output_seq=4, embedding=32, num_classes=16
    B, S_in, S_out, E, C = 2, 8, 4, 32, 16
    x = jax.random.normal(k_x, (B, S_in, E), dtype=jnp.float32)

    model = Classifier(k_p, input_sequence_length=S_in,
                       output_sequence_length=S_out,
                       embedding_dim=E, num_classes=C)

    y = model(x)
    jax.block_until_ready(y)

    ref = _reference_forward(x, model.gamma, model.beta, model.w1, model.b1,
                             model.w2, model.b2, eps=model.eps)
    assert y.shape == (B, S_out, C), (y.shape, (B, S_out, C))
    assert y.dtype == ref.dtype
    max_err = float(jnp.max(jnp.abs(y - ref)))
    assert bool(jnp.allclose(y, ref, atol=2e-3, rtol=2e-3)), f"max_err={max_err}"

    print("KERNEL_OK")
</pallas_src>

<mosaic_0001>
module attributes {stable_mosaic.version = 11 : i64} {
  func.func @_classifier_kernel(%arg0: i32, %arg1: memref<2x8x32xf32, #tpu.memory_space<vmem>>, %arg2: memref<1x32xf32, #tpu.memory_space<vmem>>, %arg3: memref<1x32xf32, #tpu.memory_space<vmem>>, %arg4: memref<4x8xf32, #tpu.memory_space<vmem>>, %arg5: memref<4x1xf32, #tpu.memory_space<vmem>>, %arg6: memref<32x16xf32, #tpu.memory_space<vmem>>, %arg7: memref<1x16xf32, #tpu.memory_space<vmem>>, %arg8: memref<2x4x16xf32, #tpu.memory_space<vmem>>, %arg9: memref<8x32xf32, #tpu.memory_space<vmem>>) attributes {dimension_semantics = [#tpu.dimension_semantics<parallel>], iteration_bounds = array<i64: 1>, scalar_prefetch = 0 : i64, scratch_operands = 1 : i64, tpu.core_type = #tpu.core_type<tc>, window_params = [{transform_indices = @transform_0, window_bounds = array<i64: 2, 8, 32>}, {pipeline_mode = #tpu.pipeline_mode<synchronous>, transform_indices = @transform_1, window_bounds = array<i64: 1, 32>}, {pipeline_mode = #tpu.pipeline_mode<synchronous>, transform_indices = @transform_2, window_bounds = array<i64: 1, 32>}, {pipeline_mode = #tpu.pipeline_mode<synchronous>, transform_indices = @transform_3, window_bounds = array<i64: 4, 8>}, {pipeline_mode = #tpu.pipeline_mode<synchronous>, transform_indices = @transform_4, window_bounds = array<i64: 4, 1>}, {pipeline_mode = #tpu.pipeline_mode<synchronous>, transform_indices = @transform_5, window_bounds = array<i64: 32, 16>}, {pipeline_mode = #tpu.pipeline_mode<synchronous>, transform_indices = @transform_6, window_bounds = array<i64: 1, 16>}, {transform_indices = @transform_7, window_bounds = array<i64: 2, 4, 16>}]} {
    %c0 = arith.constant 0 : index
    %c0_0 = arith.constant 0 : index
    %c0_1 = arith.constant 0 : index
    %0 = vector.load %arg1[%c0, %c0_0, %c0_1] : memref<2x8x32xf32, #tpu.memory_space<vmem>>, vector<2x8x32xf32>
    %cst = arith.constant dense<0.000000e+00> : vector<2x8xf32>
    %1 = vector.multi_reduction <add>, %0, %cst [2] : vector<2x8x32xf32> to vector<2x8xf32>
    %2 = vector.shape_cast %1 : vector<2x8xf32> to vector<2x8x1xf32>
    %cst_2 = arith.constant 3.200000e+01 : f32
    %3 = vector.broadcast %cst_2 : f32 to vector<2x8x1xf32>
    %4 = arith.divf %2, %3 : vector<2x8x1xf32>
    %5 = vector.broadcast %4 : vector<2x8x1xf32> to vector<2x8x32xf32>
    %6 = arith.subf %0, %5 : vector<2x8x32xf32>
    %7 = arith.mulf %6, %6 : vector<2x8x32xf32>
    %cst_3 = arith.constant dense<0.000000e+00> : vector<2x8xf32>
    %8 = vector.multi_reduction <add>, %7, %cst_3 [2] : vector<2x8x32xf32> to vector<2x8xf32>
    %9 = vector.shape_cast %8 : vector<2x8xf32> to vector<2x8x1xf32>
    %cst_4 = arith.constant 3.200000e+01 : f32
    %10 = vector.broadcast %cst_4 : f32 to vector<2x8x1xf32>
    %11 = arith.divf %9, %10 : vector<2x8x1xf32>
    %cst_5 = arith.constant 9.99999974E-6 : f32
    %12 = vector.broadcast %cst_5 : f32 to vector<2x8x1xf32>
    %13 = arith.addf %11, %12 : vector<2x8x1xf32>
    %14 = math.rsqrt %13 : vector<2x8x1xf32>
    %15 = vector.broadcast %14 : vector<2x8x1xf32> to vector<2x8x32xf32>
    %16 = arith.mulf %6, %15 : vector<2x8x32xf32>
    %c0_6 = arith.constant 0 : index
    %c0_7 = arith.constant 0 : index
    %17 = vector.load %arg2[%c0_6, %c0_7] : memref<1x32xf32, #tpu.memory_space<vmem>>, vector<1x32xf32>
    %18 = vector.shape_cast %17 : vector<1x32xf32> to vector<1x1x32xf32>
    %19 = vector.broadcast %18 : vector<1x1x32xf32> to vector<2x8x32xf32>
    %20 = arith.mulf %16, %19 : vector<2x8x32xf32>
    %c0_8 = arith.constant 0 : index
    %c0_9 = arith.constant 0 : index
    %21 = vector.load %arg3[%c0_8, %c0_9] : memref<1x32xf32, #tpu.memory_space<vmem>>, vector<1x32xf32>
    %22 = vector.shape_cast %21 : vector<1x32xf32> to vector<1x1x32xf32>
    %23 = vector.broadcast %22 : vector<1x1x32xf32> to vector<2x8x32xf32>
    %24 = arith.addf %20, %23 : vector<2x8x32xf32>
    %c0_10 = arith.constant 0 : index
    %c0_11 = arith.constant 0 : index
    %25 = vector.load %arg4[%c0_10, %c0_11] : memref<4x8xf32, #tpu.memory_space<vmem>>, vector<4x8xf32>
    %c0_12 = arith.constant 0 : index
    %c0_13 = arith.constant 0 : index
    %26 = vector.load %arg5[%c0_12, %c0_13] : memref<4x1xf32, #tpu.memory_space<vmem>>, vector<4x1xf32>
    %27 = vector.extract_strided_slice %24 {offsets = [0, 0, 0], sizes = [1, 8, 32], strides = [1, 1, 1]} : vector<2x8x32xf32> to vector<1x8x32xf32>
    %28 = vector.shape_cast %27 : vector<1x8x32xf32> to vector<8x32xf32>
    %cst_14 = arith.constant dense<0.000000e+00> : vector<4x32xf32>
    %29 = tpu.matmul %25, %28, %cst_14 {dimension_numbers = #tpu.dot_dimension_numbers<[1], [0], [0], [1], [0, 0, 1, 1], [], []>} : vector<4x8xf32>, vector<8x32xf32>, vector<4x32xf32> -> vector<4x32xf32>
    %30 = vector.broadcast %26 : vector<4x1xf32> to vector<4x32xf32>
    %31 = arith.addf %29, %30 : vector<4x32xf32>
    %c0_15 = arith.constant 0 : index
    %c0_16 = arith.constant 0 : index
    %32 = vector.load %arg9[%c0_15, %c0_16] : memref<8x32xf32, #tpu.memory_space<vmem>>, vector<4x32xf32>
    tpu.vector_store %arg9[%c0_15, %c0_16], %31 {strides = array<i32>} : memref<8x32xf32, #tpu.memory_space<vmem>>, vector<4x32xf32>,
    %33 = vector.extract_strided_slice %24 {offsets = [1, 0, 0], sizes = [1, 8, 32], strides = [1, 1, 1]} : vector<2x8x32xf32> to vector<1x8x32xf32>
    %34 = vector.shape_cast %33 : vector<1x8x32xf32> to vector<8x32xf32>
    %cst_17 = arith.constant dense<0.000000e+00> : vector<4x32xf32>
    %35 = tpu.matmul %25, %34, %cst_17 {dimension_numbers = #tpu.dot_dimension_numbers<[1], [0], [0], [1], [0, 0, 1, 1], [], []>} : vector<4x8xf32>, vector<8x32xf32>, vector<4x32xf32> -> vector<4x32xf32>
    %36 = vector.broadcast %26 : vector<4x1xf32> to vector<4x32xf32>
    %37 = arith.addf %35, %36 : vector<4x32xf32>
    %c4 = arith.constant 4 : index
    %c0_18 = arith.constant 0 : index
    %38 = vector.load %arg9[%c4, %c0_18] : memref<8x32xf32, #tpu.memory_space<vmem>>, vector<4x32xf32>
    tpu.vector_store %arg9[%c4, %c0_18], %37 {strides = array<i32>} : memref<8x32xf32, #tpu.memory_space<vmem>>, vector<4x32xf32>,
    %c0_19 = arith.constant 0 : index
    %c0_20 = arith.constant 0 : index
    %39 = vector.load %arg9[%c0_19, %c0_20] : memref<8x32xf32, #tpu.memory_space<vmem>>, vector<8x32xf32>
    %c0_21 = arith.constant 0 : index
    %c0_22 = arith.constant 0 : index
    %40 = vector.load %arg6[%c0_21, %c0_22] : memref<32x16xf32, #tpu.memory_space<vmem>>, vector<32x16xf32>
    %cst_23 = arith.constant dense<0.000000e+00> : vector<8x16xf32>
    %41 = tpu.matmul %39, %40, %cst_23 {dimension_numbers = #tpu.dot_dimension_numbers<[1], [0], [0], [1], [0, 0, 1, 1], [], []>} : vector<8x32xf32>, vector<32x16xf32>, vector<8x16xf32> -> vector<8x16xf32>
    %c0_24 = arith.constant 0 : index
    %c0_25 = arith.constant 0 : index
    %42 = vector.load %arg7[%c0_24, %c0_25] : memref<1x16xf32, #tpu.memory_space<vmem>>, vector<1x16xf32>
    %43 = vector.broadcast %42 : vector<1x16xf32> to vector<8x16xf32>
    %44 = arith.addf %41, %43 : vector<8x16xf32>
    %45 = vector.extract_strided_slice %44 {offsets = [0, 0], sizes = [4, 16], strides = [1, 1]} : vector<8x16xf32> to vector<4x16xf32>
    %c0_26 = arith.constant 0 : index
    %c0_27 = arith.constant 0 : index
    %c0_28 = arith.constant 0 : index
    %46 = vector.load %arg8[%c0_26, %c0_27, %c0_28] : memref<2x4x16xf32, #tpu.memory_space<vmem>>, vector<1x4x16xf32>
    %47 = vector.shape_cast %46 : vector<1x4x16xf32> to vector<4x16xf32>
    %48 = vector.shape_cast %45 : vector<4x16xf32> to vector<1x4x16xf32>
    tpu.vector_store %arg8[%c0_26, %c0_27, %c0_28], %48 {strides = array<i32>} : memref<2x4x16xf32, #tpu.memory_space<vmem>>, vector<1x4x16xf32>,
    %49 = vector.extract_strided_slice %44 {offsets = [4, 0], sizes = [4, 16], strides = [1, 1]} : vector<8x16xf32> to vector<4x16xf32>
    %c1 = arith.constant 1 : index
    %c0_29 = arith.constant 0 : index
    %c0_30 = arith.constant 0 : index
    %50 = vector.load %arg8[%c1, %c0_29, %c0_30] : memref<2x4x16xf32, #tpu.memory_space<vmem>>, vector<1x4x16xf32>
    %51 = vector.shape_cast %50 : vector<1x4x16xf32> to vector<4x16xf32>
    %52 = vector.shape_cast %49 : vector<4x16xf32> to vector<1x4x16xf32>
    tpu.vector_store %arg8[%c1, %c0_29, %c0_30], %52 {strides = array<i32>} : memref<2x4x16xf32, #tpu.memory_space<vmem>>, vector<1x4x16xf32>,
    return
  }
  func.func @transform_0(%arg0: i32) -> (i32, i32, i32) {
    %c0_i32 = arith.constant 0 : i32
    %c0_i32_0 = arith.constant 0 : i32
    %c0_i32_1 = arith.constant 0 : i32
    return %arg0, %c0_i32, %c0_i32_0 : i32, i32, i32
  }
  func.func @transform_1(%arg0: i32) -> (i32, i32) {
    %c0_i32 = arith.constant 0 : i32
    %c0_i32_0 = arith.constant 0 : i32
    %c0_i32_1 = arith.constant 0 : i32
    return %c0_i32, %c0_i32_0 : i32, i32
  }
  func.func @transform_2(%arg0: i32) -> (i32, i32) {
    %c0_i32 = arith.constant 0 : i32
    %c0_i32_0 = arith.constant 0 : i32
    %c0_i32_1 = arith.constant 0 : i32
    return %c0_i32, %c0_i32_0 : i32, i32
  }
  func.func @transform_3(%arg0: i32) -> (i32, i32) {
    %c0_i32 = arith.constant 0 : i32
    %c0_i32_0 = arith.constant 0 : i32
    %c0_i32_1 = arith.constant 0 : i32
    return %c0_i32, %c0_i32_0 : i32, i32
  }
  func.func @transform_4(%arg0: i32) -> (i32, i32) {
    %c0_i32 = arith.constant 0 : i32
    %c0_i32_0 = arith.constant 0 : i32
    %c0_i32_1 = arith.constant 0 : i32
    return %c0_i32, %c0_i32_0 : i32, i32
  }
  func.func @transform_5(%arg0: i32) -> (i32, i32) {
    %c0_i32 = arith.constant 0 : i32
    %c0_i32_0 = arith.constant 0 : i32
    %c0_i32_1 = arith.constant 0 : i32
    return %c0_i32, %c0_i32_0 : i32, i32
  }
  func.func @transform_6(%arg0: i32) -> (i32, i32) {
    %c0_i32 = arith.constant 0 : i32
    %c0_i32_0 = arith.constant 0 : i32
    %c0_i32_1 = arith.constant 0 : i32
    return %c0_i32, %c0_i32_0 : i32, i32
  }
  func.func @transform_7(%arg0: i32) -> (i32, i32, i32) {
    %c0_i32 = arith.constant 0 : i32
    %c0_i32_0 = arith.constant 0 : i32
    %c0_i32_1 = arith.constant 0 : i32
    return %arg0, %c0_i32, %c0_i32_0 : i32, i32, i32
  }
}

</mosaic_0001>

<bundles_post_ra>
// kernel: tpu_custom_call.1
= control target key start
LH: loop header
LB: loop body
LE: loop exit
PB: predicated region body
PF: predicated region fallthrough
CT: control target
= control target key end

     0   :  { %vm29_vm0 = vcmask 261120   ;;  %s513_s0 = inlined_call_operand.vmem [shape: f32[2,8,32], index: 0, kind: input, shape index: {}]   ;;  %s514_s1 = inlined_call_operand.vmem [shape: f32[1,32], index: 1, kind: input, shape index: {}]   ;;  %s515_s2 = inlined_call_operand.vmem [shape: f32[1,32], index: 2, kind: input, shape index: {}]   ;;  %s516_s3 = inlined_call_operand.vmem [shape: f32[4,8], index: 3, kind: input, shape index: {}]   ;;  %s517_s4 = inlined_call_operand.vmem [shape: f32[4,1], index: 4, kind: input, shape index: {}]   ;;  %s518_s5 = inlined_call_operand.vmem [shape: f32[32,16], index: 5, kind: input, shape index: {}]   ;;  %s519_s6 = inlined_call_operand.vmem [shape: f32[1,16], index: 6, kind: input, shape index: {}]   ;;  %s520_s7 = inlined_call_operand.hbm [shape: f32[2,4,16], index: 7, kind: output, shape index: {}]  }
   0x1   :  { %v27_v0 = vld [vmem:[%s513_s0] sm:$0xff]  ;;  %v28_v1 = vld [vmem:[%s513_s0 + $0x8] sm:$0xff] }
   0x2   :  { %12 = vsyncpa [#allocation4], 0  ;;  %v30_v2 = vsel %vm29_vm0, %v27_v0, 0.0  ;;  %v33_v3 = vsel %vm29_vm0, %v28_v1, 0.0  ;;  %v413_v14 = vmov 0.0   ;;  %vm414_vm1 = vmmov 0  }
   0x3   :  { %31 = vadd.xlane.f32.xlu0 %v30_v2  ;;  %350 = vmatprep.subr.mxu1 %v413_v14  ;;  %v76_v15 = vld [vmem:[%s517_s4] sm:$0xf]  ;;  %v415_v16 = vmov 0   ;;  %vm82_vm2 = vcmask 64512   ;;  %v231_v35 = vld [vmem:[%s518_s5 + $0x8] sm:$0xff]  ;;  %v416_v37 = vmov 0.0|0.0  }
   0x4   :  { %352 = vmatprep.mubr.msk.f32.mxu1 %vm414_vm1, %v413_v14  ;;  %368 = vmatprep.mubr.msk.f32.mxu0 %vm414_vm1, %v413_v14  ;;  %v335_v24 = vld [vmem:[%s514_s1] ss:$0 sm:$0xff]  ;;  %v232_v38 = vld [vmem:[%s518_s5 + $0x10] sm:$0xff]  ;;  %v233_v39 = vld [vmem:[%s518_s5 + $0x18] sm:$0xff]  ;;  %vm156_vm3 = vcmask 257024   ;;  %s417_s16 = smov [#allocation3]  }
   0x5   :  { %384 = vset.pattern.permute.xlu0 %v415_v16  ;;  %v336_v26 = vld [vmem:[%s515_s2] ss:$0 sm:$0xff]  ;;  %371 = vmatprep.subr.bf16.mxu0 %v416_v37  ;;  %v375_v40 = vpack.c.bf16 %v233_v39, %v232_v38  ;;  %s324_s17 = sshll.u32 %s417_s16, 4  ;;  %vm314_vm4 = vcmask 125952   ;;  %vm317_vm5 = vcmask 130052   ;;  %s325_s17 = int_to_ptr.vmem [resolvable:$true] %s324_s17 }
   0x6   :  { %v75_v31 = vld [vmem:[%s516_s3] sm:$0xf]  ;;  %s389_s19 = scalar_lea.vmem %s325_s17, 128  ;;  %p394_p1 = scmp.lt.s32.totalorder %s325_s17, %s325_s17 }
   0x7   :  { %34 = vadd.xlane.f32.xlu0 %v33_v3  ;;  %v230_v34 = vld [vmem:[%s518_s5] sm:$0xff]  ;;  %p390_p0 = scmp.ne.s32.totalorder %s325_s17, %s389_s19  ;;  %p395_p2 = scmp.lt.s32.totalorder %s389_s19, %s389_s19 }
   0x8   :  { %v372_v36 = vpack.c.bf16 %v231_v35, %v230_v34  ;;  %v339_v49 = vld [vmem:[%s519_s6] ss:$0 sm:$0xff] }
   0x9   :  { %p396_p3 = por %p395_p2, %p394_p1 }
   0xa   :  { %373 = vmatpush3.bf16.msra.mxu0 %v372_v36 }
   0xb   :  { %374 = vmatprep.subr.bf16.mxu0 %v416_v37  ;;  %p397_p4 = pnand %p396_p3, %p390_p0 }
   0xe   :  { %376 = vmatpush3.bf16.msra.mxu0 %v375_v40 }
  0x1d   :  { %79 = vperm.xlu0 %384, %v76_v15  }
  0x90   :  { %v32_v4 = vpop.xlane.xlu0 %31 }
  0x91   :  { %v37_v5 = vmul.f32 0.03125, %v32_v4 }
  0x93   :  { %v39_v6 = vsub.f32 %v27_v0, %v37_v5 }
  0x94   :  { %v35_v7 = vpop.xlane.xlu0 %34 }
  0x95   :  { %v38_v8 = vmul.f32 0.03125, %v35_v7  ;;  %v41_v9 = vmul.f32 %v39_v6, %v39_v6 }
  0x97   :  { %v40_v10 = vsub.f32 %v28_v1, %v38_v8  ;;  %v43_v11 = vsel %vm29_vm0, %v41_v9, 0.0 }
  0x98   :  { %44 = vadd.xlane.f32.xlu1 %v43_v11 }
  0x99   :  { %v42_v12 = vmul.f32 %v40_v10, %v40_v10 }
  0x9b   :  { %v46_v13 = vsel %vm29_vm0, %v42_v12, 0.0 }
  0x9c   :  { %47 = vadd.xlane.f32.xlu1 %v46_v13  ;;  %v80_v41 = vpop.permute.xlu0 %79 }
 0x125   :  { %v45_v17 = vpop.xlane.xlu1 %44 }
 0x126   :  { %v49_v18 = vmul.f32 0.03125, %v45_v17 }
 0x128   :  { %v51_v19 = vadd.f32 1e-05, %v49_v18 }
 0x129   :  { %v48_v20 = vpop.xlane.xlu1 %47 }
 0x12a   :  { %385 = vrsqrt.f32 %v51_v19  ;;  %v50_v21 = vmul.f32 0.03125, %v48_v20 }
 0x12c   :  { %v52_v22 = vadd.f32 1e-05, %v50_v21 }
 0x12e   :  { %387 = vrsqrt.f32 %v52_v22 }
 0x134   :  { %v386_v23 = vpop.eup %385 }
 0x135   :  { %v55_v25 = vmul.f32 %v386_v23, %v39_v6 }
 0x137   :  { %v64_v27 = vmul.f32 %v335_v24, %v55_v25 }
 0x138   :  { %v388_v28 = vpop.eup %387 }
 0x139   :  { %v56_v29 = vmul.f32 %v388_v28, %v40_v10  ;;  %v73_v30 = vadd.f32 %v336_v26, %v64_v27 }
 0x13b   :  { %v65_v32 = vmul.f32 %v335_v24, %v56_v29  ;;  %351 = vmatpush3.msra.mxu1 %v73_v30 }
 0x13c   :  { %353 = vmatmul.mubr.msk.f32.vlgmr.msra.gmra.mrb[0].mxu1 %vm82_vm2, %v75_v31  ;;  %355 = vmatprep.subr.mxu1 %v413_v14 }
 0x13d   :  { %v74_v33 = vadd.f32 %v336_v26, %v65_v32  ;;  %357 = vmatprep.mubr.msk.f32.mxu1 %vm414_vm1, %v413_v14 }
 0x13f   :  { %356 = vmatpush3.msra.mxu1 %v74_v33 }
 0x140   :  { %358 = vmatmul.mubr.msk.f32.vlgmr.msra.gmra.mrb[2].mxu1 %vm82_vm2, %v75_v31 }
 0x20f   :  { %v152_v42 = vpop.f32.mrb[0].mxu1 }
 0x210   :  { %v354_v43 = vpop.f32.mrb[1].mxu1  ;;  %v153_v44 = vadd.f32 %v152_v42, %v80_v41 }
 0x212   :  { %157 = vst.msk [vmem:[#allocation2] sm:$0xf] %vm156_vm3, %v153_v44 }
 0x213   :  { %v224_v45 = vpop.f32.mrb[2].mxu1 }
 0x214   :  { %v225_v46 = vadd.f32 %v224_v45, %v80_v41  ;;  %v359_v47 = vpop.f32.mrb[3].mxu1 }
 0x216   :  { %228 = vst.msk [vmem:[#allocation2 + $0x4] sm:$0xf] %vm156_vm3, %v225_v46 }
 0x21d   :  { %v229_v48 = vld [vmem:[#allocation2] sm:$0xff] }
 0x21e   :  { %369 = vmatmul.mubr.msk.f32.vlgmr.msra.gmra.mrb[0].mxu0 %vm29_vm0, %v229_v48 }
 0x2f1   :  { %v310_v50 = vpop.f32.mrb[0].mxu0 }
 0x2f2   :  { %v311_v51 = vadd.f32 %v339_v49, %v310_v50  ;;  %v370_v52 = vpop.f32.mrb[1].mxu0 }
 0x2f4   :  { %315 = vst.msk [vmem:[#allocation3] sm:$0xf] %vm314_vm4, %v311_v51 }
 0x2f5   :  { %318 = vst.msk [vmem:[#allocation3] sm:$0xf0] %vm317_vm5, %v311_v51 }
 0x2f6   :  { %400 = shalt.err (!%p397_p4)
}
 0x2f7   :  { %s401_s22 = scalar_lea.hbm %s520_s7, 128 }
 0x2f8   :  { %p402_p5 = scmp.ne.s32.totalorder %s520_s7, %s401_s22  ;;  %p405_p6 = scmp.lt.u32.totalorder %s401_s22, %s520_s7 }
 0x2fa   :  { %p407_p7 = pnand %p405_p6, %p402_p5 }
 0x2fc   :  { %410 = shalt.err (!%p407_p7)
}
 0x2fd   :  { %s418_s26 = smov 64   ;;  %s419_s27 = smov 4  }
 0x2fe   :  { %330 = dma.vmem_to_hbm [thread:$0]  %s325_s17, 128, %s520_s7, [#allocation4], %s418_s26, %s418_s26, %s419_s27  }
 0x2ff   :  { %411 = dma.done.wait [#allocation4], 128  }
 0x300   :  { %412 = vsyncadd [#allocation4], 4294967168 }
 0x301   :  { %334 = vsyncpa [#allocation4], 1 }

</bundles_post_ra>
